<compile_context>
chip_gen: v7x
topology: tpu7x:2x2x1
jax: 0.10.0
libtpu: 0.0.40
codegen_flags: <defaults>
</compile_context>

<pallas_src>
import jax
import jax.numpy as jnp
from jax.experimental import pallas as pl
from jax.experimental.pallas import tpu as pltpu


def span_comparison_kernel(x_ref, spans_ref, wcomb_ref, batt_ref, bcls_ref, o_ref):
    """One batch tile of SpanComparisonHead (span extraction + classifier).

    x_ref     : [TB, S, H]       encoder unpooled activations (native dtype)
    spans_ref : [TB, 1, 2*NS]    int32 [s0, e0, s1, e1, ...] (end inclusive)
    wcomb_ref : [H, 1 + NS*L]    col 0 = attention Linear(H,1) weight,
                                 cols 1+n*L..1+(n+1)*L = classifier weight of span n
    batt_ref  : [1, 1]           attention Linear(H,1) bias (SMEM scalar)
    bcls_ref  : [1, L]           classifier bias
    o_ref     : [TB, 1, L]       output logits tile
    """
    x = x_ref[...]                                   # [TB, S, H], native dtype
    tb, s, h = x.shape
    ns = spans_ref.shape[2] // 2
    nl = bcls_ref.shape[1]

    # Single stationary-weight MXU matmul per grid step (f32 accumulation).
    proj = jnp.dot(x.reshape(tb * s, h), wcomb_ref[...],
                   preferred_element_type=jnp.float32).reshape(tb, s, -1)

    # Global attention logits.  The bias is a per-span constant shift that
    # cancels in the softmax; kept for fidelity with nn.Linear(H, 1).
    attn = proj[:, :, 0] + batt_ref[0, 0]            # [TB, S] f32

    pos = jax.lax.broadcasted_iota(jnp.int32, (1, s), 1)   # [1, S]
    sp = spans_ref[:, 0, :]                                # [TB, 2*NS] int32

    neg = jnp.float32(-1e30)
    logits = jnp.zeros((tb, nl), jnp.float32) + bcls_ref[...]
    for n in range(ns):                               # NS is tiny & static
        start = sp[:, 2 * n:2 * n + 1]                # [TB, 1]
        end = sp[:, 2 * n + 1:2 * n + 2]              # [TB, 1]
        in_span = (pos >= start) & (pos <= end)       # [TB, S]
        masked = jnp.where(in_span, attn, neg)
        m = jnp.max(masked, axis=-1, keepdims=True)   # [TB, 1]
        p = jnp.exp(masked - m)       # out-of-span -> exp(-1e30 - m) == 0
        denom = jnp.sum(p, axis=-1, keepdims=True)
        # Degenerate / padded spans (no in-span token) contribute zero instead
        # of NaN or a full-sequence softmax.
        inv = jnp.where(m > 0.5 * neg,
                        pl.reciprocal(denom, approx=True),
                        jnp.float32(0.0))
        w = p * inv                                   # [TB, S] softmax weights
        proj_n = proj[:, :, 1 + n * nl:1 + (n + 1) * nl]     # [TB, S, L] f32
        logits = logits + jnp.sum(w[:, :, None] * proj_n, axis=1)

    o_ref[:, 0, :] = logits.astype(o_ref.dtype)


def span_comparison_forward(unpooled, spans, w_att, b_att, w_cls, b_cls,
                            *, tile_b=None):
    """JAX wrapper (layout glue + pallas_call).

    unpooled : [B, S, H]   encoder output, kept in its native dtype (bf16/f32)
    spans    : [B, NS, 2]  int (start, end) token indices, end inclusive
    w_att    : [H]         SelfAttentiveSpanExtractor global-attention weight
    b_att    : []          ... bias (scalar)
    w_cls    : [NS*H, L]   SpanComparisonHead.classifier.weight transposed
    b_cls    : [L]         SpanComparisonHead.classifier.bias
    returns  : [B, L] float32 logits
    """
    B, S, H = unpooled.shape
    NS = spans.shape[1]
    L = w_cls.shape[1]
    assert w_cls.shape[0] == NS * H
    C = 1 + NS * L

    # ---- generation-aware VMEM budget (128 MiB on v5e/v6e, 64 MiB on v7x) ---
    try:
        vmem_cap = int(getattr(pltpu.get_tpu_info(), "vmem_capacity_bytes",
                               64 * 1024 * 1024))
    except Exception:
        vmem_cap = 64 * 1024 * 1024            # conservative (v7x-sized)
    vmem_limit = min(vmem_cap // 2, 96 * 1024 * 1024)

    if tile_b is None:
        itemsize = jnp.dtype(unpooled.dtype).itemsize
        # per-batch-row cost: 2x (double-buffered) x rows + the lane-padded
        # f32 [S, C]->[S,128] proj + per-span [S, L]->[S,128] weighted slice
        # + a few dense [S] f32 softmax temporaries.
        per_row = S * (2 * H * itemsize + 2 * 128 * 4 + 8 * 4)
        tile_b = max(1, min(B, (vmem_limit // 2) // max(1, per_row)))
        # prefer an exact divisor of B near the budget; otherwise keep the
        # budgeted size and accept a partial tail block (never decay to 1).
        div = max(d for d in range(1, tile_b + 1) if B % d == 0)
        if 2 * div >= tile_b:
            tile_b = div
    tile_b = max(1, min(tile_b, B))
    # keep >=2 grid steps when possible: pipelining + both v7x TensorCores.
    if tile_b == B and B > 1:
        tile_b = pl.cdiv(B, 2)
    grid = (pl.cdiv(B, tile_b),)

    # ---- host-side layout glue only (no compute hoisted out of the kernel) --
    # spans: [B, 1, 2*NS] int32 -> lane-dense, last-two block dims == full dims.
    spans_flat = spans.astype(jnp.int32).reshape(B, 1, 2 * NS)
    # fused projection weight: [attention column | per-span classifier slabs],
    # cast to the activation dtype so the MXU runs the native-dtype path.
    wcls_cols = jnp.asarray(w_cls).reshape(NS, H, L).transpose(1, 0, 2).reshape(H, NS * L)
    wcomb = jnp.concatenate([jnp.asarray(w_att).reshape(H, 1), wcls_cols],
                            axis=1).astype(unpooled.dtype)          # [H, C]
    batt = jnp.asarray(b_att, jnp.float32).reshape(1, 1)
    bcls = jnp.asarray(b_cls, jnp.float32).reshape(1, L)

    out = pl.pallas_call(
        span_comparison_kernel,
        out_shape=jax.ShapeDtypeStruct((B, 1, L), jnp.float32),
        grid=grid,
        in_specs=[
            # streamed, double-buffered per-batch-tile inputs
            pl.BlockSpec((tile_b, S, H), lambda i: (i, 0, 0)),
            pl.BlockSpec((tile_b, 1, 2 * NS), lambda i: (i, 0, 0)),
            # small parameters pinned resident across the whole grid
            pl.BlockSpec((H, C), lambda i: (0, 0)),
            pl.BlockSpec(memory_space=pltpu.MemorySpace.SMEM),   # scalar bias
            pl.BlockSpec((1, L), lambda i: (0, 0)),
        ],
        out_specs=pl.BlockSpec((tile_b, 1, L), lambda i: (i, 0, 0)),
        compiler_params=pltpu.CompilerParams(
            dimension_semantics=("parallel",),   # batch tiles are independent
            vmem_limit_bytes=vmem_limit,
        ),
    )(unpooled, spans_flat, wcomb, batt, bcls)

    return out[:, 0, :]


# TODO(synk): self.encoder.encode(...) is an external injected transformer; its
# `unpooled` output is taken as a kernel input here.
# TODO(synk): compute_loss=True branch (CrossEntropyLoss over label_id) is a
# training-only path and is not implemented.
# TODO(synk): head dropout is identity at inference and is therefore omitted.


if __name__ == "__main__":
    key = jax.random.PRNGKey(0)
    B, S, H = 4, 16, 32          # small test shapes
    NS, L = 2, 2                 # num_spans, num_labels

    k1, k2, k3, k4, k5, k6 = jax.random.split(key, 6)
    unpooled = jax.random.normal(k1, (B, S, H), dtype=jnp.float32)
    span_start = jax.random.randint(k2, (B, NS), 0, S - 4)
    span_width = jax.random.randint(k3, (B, NS), 0, 4)
    spans = jnp.stack([span_start, span_start + span_width], axis=-1).astype(jnp.int32)

    w_att = jax.random.normal(k4, (H,), dtype=jnp.float32) * 0.1          # Linear(H,1).weight
    b_att = jnp.float32(0.05)                                             # Linear(H,1).bias
    w_cls = jax.random.normal(k5, (NS * H, L), dtype=jnp.float32) * 0.05  # classifier.weight.T
    b_cls = jax.random.normal(k6, (L,), dtype=jnp.float32) * 0.02         # classifier.bias

    logits = span_comparison_forward(unpooled, spans, w_att, b_att, w_cls, b_cls)
    jax.block_until_ready(logits)

    # ---- pure-JAX reference of the same semantics ---------------------------
    attn = unpooled @ w_att + b_att                                    # [B, S]
    pos = jnp.arange(S)[None, None, :]
    mask = (pos >= spans[..., 0:1]) & (pos <= spans[..., 1:2])         # [B, NS, S]
    masked = jnp.where(mask, attn[:, None, :], -jnp.inf)
    wts = jax.nn.softmax(masked, axis=-1)
    wts = jnp.where(mask, wts, 0.0)
    span_emb = jnp.einsum('bns,bsh->bnh', wts, unpooled)               # [B, NS, H]
    ref = span_emb.reshape(B, NS * H) @ w_cls + b_cls                  # [B, L]

    assert logits.shape == (B, L)
    # tolerance covers MXU f32 accumulation + approx EUP reciprocal in softmax
    assert jnp.allclose(logits, ref, atol=2e-2, rtol=2e-2), "mismatch vs reference"

    print("KERNEL_OK")
</pallas_src>

<mosaic_0001>
module attributes {stable_mosaic.version = 11 : i64} {
  func.func @span_comparison_kernel(%arg0: i32, %arg1: memref<2x16x32xf32, #tpu.memory_space<vmem>>, %arg2: memref<2x1x4xi32, #tpu.memory_space<vmem>>, %arg3: memref<32x5xf32, #tpu.memory_space<vmem>>, %arg4: memref<1x1xf32, #tpu.memory_space<smem>>, %arg5: memref<1x2xf32, #tpu.memory_space<vmem>>, %arg6: memref<2x1x2xf32, #tpu.memory_space<vmem>>) attributes {dimension_semantics = [#tpu.dimension_semantics<parallel>], iteration_bounds = array<i64: 2>, scalar_prefetch = 0 : i64, scratch_operands = 0 : i64, tpu.core_type = #tpu.core_type<tc>, window_params = [{transform_indices = @transform_0, window_bounds = array<i64: 2, 16, 32>}, {transform_indices = @transform_1, window_bounds = array<i64: 2, 1, 4>}, {pipeline_mode = #tpu.pipeline_mode<synchronous>, transform_indices = @transform_2, window_bounds = array<i64: 32, 5>}, {transform_indices = @transform_3, window_bounds = array<i64: 1, 1>}, {pipeline_mode = #tpu.pipeline_mode<synchronous>, transform_indices = @transform_4, window_bounds = array<i64: 1, 2>}, {transform_indices = @transform_5, window_bounds = array<i64: 2, 1, 2>}]} {
    %c0 = arith.constant 0 : index
    %c0_0 = arith.constant 0 : index
    %c0_1 = arith.constant 0 : index
    %0 = vector.load %arg1[%c0, %c0_0, %c0_1] : memref<2x16x32xf32, #tpu.memory_space<vmem>>, vector<2x16x32xf32>
    %1 = vector.shape_cast %0 : vector<2x16x32xf32> to vector<32x32xf32>
    %c0_2 = arith.constant 0 : index
    %c0_3 = arith.constant 0 : index
    %2 = vector.load %arg3[%c0_2, %c0_3] : memref<32x5xf32, #tpu.memory_space<vmem>>, vector<32x5xf32>
    %cst = arith.constant dense<0.000000e+00> : vector<32x5xf32>
    %3 = tpu.matmul %1, %2, %cst {dimension_numbers = #tpu.dot_dimension_numbers<[1], [0], [0], [1], [0, 0, 1, 1], [], []>} : vector<32x32xf32>, vector<32x5xf32>, vector<32x5xf32> -> vector<32x5xf32>
    %4 = vector.shape_cast %3 : vector<32x5xf32> to vector<2x16x5xf32>
    %5 = vector.extract_strided_slice %4 {offsets = [0, 0, 0], sizes = [2, 16, 1], strides = [1, 1, 1]} : vector<2x16x5xf32> to vector<2x16x1xf32>
    %6 = vector.shape_cast %5 : vector<2x16x1xf32> to vector<2x16xf32>
    %c0_4 = arith.constant 0 : index
    %c0_5 = arith.constant 0 : index
    %7 = memref.load %arg4[%c0_4, %c0_5] : memref<1x1xf32, #tpu.memory_space<smem>>
    %8 = vector.broadcast %7 : f32 to vector<2x16xf32>
    %9 = arith.addf %6, %8 : vector<2x16xf32>
    %10 = tpu.iota {dimensions = array<i32: 1>} : vector<1x16xi32>
    %c0_6 = arith.constant 0 : index
    %c0_7 = arith.constant 0 : index
    %c0_8 = arith.constant 0 : index
    %11 = vector.load %arg2[%c0_6, %c0_7, %c0_8] : memref<2x1x4xi32, #tpu.memory_space<vmem>>, vector<2x1x4xi32>
    %12 = vector.shape_cast %11 : vector<2x1x4xi32> to vector<2x4xi32>
    %cst_9 = arith.constant 0.000000e+00 : f32
    %13 = vector.broadcast %cst_9 : f32 to vector<2x2xf32>
    %c0_10 = arith.constant 0 : index
    %c0_11 = arith.constant 0 : index
    %14 = vector.load %arg5[%c0_10, %c0_11] : memref<1x2xf32, #tpu.memory_space<vmem>>, vector<1x2xf32>
    %15 = vector.broadcast %14 : vector<1x2xf32> to vector<2x2xf32>
    %16 = arith.addf %13, %15 : vector<2x2xf32>
    %17 = vector.extract_strided_slice %12 {offsets = [0, 0], sizes = [2, 1], strides = [1, 1]} : vector<2x4xi32> to vector<2x1xi32>
    %18 = vector.extract_strided_slice %12 {offsets = [0, 1], sizes = [2, 1], strides = [1, 1]} : vector<2x4xi32> to vector<2x1xi32>
    %19 = vector.broadcast %10 : vector<1x16xi32> to vector<2x16xi32>
    %20 = vector.broadcast %17 : vector<2x1xi32> to vector<2x16xi32>
    %21 = arith.cmpi sge, %19, %20 : vector<2x16xi32>
    %22 = vector.broadcast %10 : vector<1x16xi32> to vector<2x16xi32>
    %23 = vector.broadcast %18 : vector<2x1xi32> to vector<2x16xi32>
    %24 = arith.cmpi sle, %22, %23 : vector<2x16xi32>
    %25 = arith.andi %21, %24 : vector<2x16xi1>
    %cst_12 = arith.constant -1.000000e+30 : f32
    %26 = vector.broadcast %cst_12 : f32 to vector<2x16xf32>
    %27 = arith.select %25, %9, %26 : vector<2x16xi1>, vector<2x16xf32>
    %cst_13 = arith.constant dense<0xFF800000> : vector<2xf32>
    %28 = vector.multi_reduction <maximumf>, %27, %cst_13 [1] : vector<2x16xf32> to vector<2xf32>
    %29 = vector.shape_cast %28 : vector<2xf32> to vector<2x1xf32>
    %30 = vector.broadcast %29 : vector<2x1xf32> to vector<2x16xf32>
    %31 = arith.subf %27, %30 : vector<2x16xf32>
    %32 = math.exp %31 : vector<2x16xf32>
    %cst_14 = arith.constant dense<0.000000e+00> : vector<2xf32>
    %33 = vector.multi_reduction <add>, %32, %cst_14 [1] : vector<2x16xf32> to vector<2xf32>
    %34 = vector.shape_cast %33 : vector<2xf32> to vector<2x1xf32>
    %cst_15 = arith.constant 5.000000e-01 : f32
    %cst_16 = arith.constant -1.000000e+30 : f32
    %35 = arith.mulf %cst_15, %cst_16 : f32
    %36 = vector.broadcast %35 : f32 to vector<2x1xf32>
    %37 = arith.cmpf ogt, %29, %36 : vector<2x1xf32>
    %38 = tpu.reciprocal %34 {approx = true} : vector<2x1xf32> -> vector<2x1xf32>
    %cst_17 = arith.constant 0.000000e+00 : f32
    %39 = vector.broadcast %cst_17 : f32 to vector<2x1xf32>
    %40 = arith.select %37, %38, %39 : vector<2x1xi1>, vector<2x1xf32>
    %41 = vector.broadcast %40 : vector<2x1xf32> to vector<2x16xf32>
    %42 = arith.mulf %32, %41 : vector<2x16xf32>
    %43 = vector.extract_strided_slice %4 {offsets = [0, 0, 1], sizes = [2, 16, 2], strides = [1, 1, 1]} : vector<2x16x5xf32> to vector<2x16x2xf32>
    %44 = vector.shape_cast %42 : vector<2x16xf32> to vector<2x16x1xf32>
    %45 = vector.broadcast %44 : vector<2x16x1xf32> to vector<2x16x2xf32>
    %46 = arith.mulf %45, %43 : vector<2x16x2xf32>
    %cst_18 = arith.constant dense<0.000000e+00> : vector<2x2xf32>
    %47 = vector.multi_reduction <add>, %46, %cst_18 [1] : vector<2x16x2xf32> to vector<2x2xf32>
    %48 = arith.addf %16, %47 : vector<2x2xf32>
    %49 = vector.extract_strided_slice %12 {offsets = [0, 2], sizes = [2, 1], strides = [1, 1]} : vector<2x4xi32> to vector<2x1xi32>
    %50 = vector.extract_strided_slice %12 {offsets = [0, 3], sizes = [2, 1], strides = [1, 1]} : vector<2x4xi32> to vector<2x1xi32>
    %51 = vector.broadcast %10 : vector<1x16xi32> to vector<2x16xi32>
    %52 = vector.broadcast %49 : vector<2x1xi32> to vector<2x16xi32>
    %53 = arith.cmpi sge, %51, %52 : vector<2x16xi32>
    %54 = vector.broadcast %10 : vector<1x16xi32> to vector<2x16xi32>
    %55 = vector.broadcast %50 : vector<2x1xi32> to vector<2x16xi32>
    %56 = arith.cmpi sle, %54, %55 : vector<2x16xi32>
    %57 = arith.andi %53, %56 : vector<2x16xi1>
    %cst_19 = arith.constant -1.000000e+30 : f32
    %58 = vector.broadcast %cst_19 : f32 to vector<2x16xf32>
    %59 = arith.select %57, %9, %58 : vector<2x16xi1>, vector<2x16xf32>
    %cst_20 = arith.constant dense<0xFF800000> : vector<2xf32>
    %60 = vector.multi_reduction <maximumf>, %59, %cst_20 [1] : vector<2x16xf32> to vector<2xf32>
    %61 = vector.shape_cast %60 : vector<2xf32> to vector<2x1xf32>
    %62 = vector.broadcast %61 : vector<2x1xf32> to vector<2x16xf32>
    %63 = arith.subf %59, %62 : vector<2x16xf32>
    %64 = math.exp %63 : vector<2x16xf32>
    %cst_21 = arith.constant dense<0.000000e+00> : vector<2xf32>
    %65 = vector.multi_reduction <add>, %64, %cst_21 [1] : vector<2x16xf32> to vector<2xf32>
    %66 = vector.shape_cast %65 : vector<2xf32> to vector<2x1xf32>
    %cst_22 = arith.constant 5.000000e-01 : f32
    %cst_23 = arith.constant -1.000000e+30 : f32
    %67 = arith.mulf %cst_22, %cst_23 : f32
    %68 = vector.broadcast %67 : f32 to vector<2x1xf32>
    %69 = arith.cmpf ogt, %61, %68 : vector<2x1xf32>
    %70 = tpu.reciprocal %66 {approx = true} : vector<2x1xf32> -> vector<2x1xf32>
    %cst_24 = arith.constant 0.000000e+00 : f32
    %71 = vector.broadcast %cst_24 : f32 to vector<2x1xf32>
    %72 = arith.select %69, %70, %71 : vector<2x1xi1>, vector<2x1xf32>
    %73 = vector.broadcast %72 : vector<2x1xf32> to vector<2x16xf32>
    %74 = arith.mulf %64, %73 : vector<2x16xf32>
    %75 = vector.extract_strided_slice %4 {offsets = [0, 0, 3], sizes = [2, 16, 2], strides = [1, 1, 1]} : vector<2x16x5xf32> to vector<2x16x2xf32>
    %76 = vector.shape_cast %74 : vector<2x16xf32> to vector<2x16x1xf32>
    %77 = vector.broadcast %76 : vector<2x16x1xf32> to vector<2x16x2xf32>
    %78 = arith.mulf %77, %75 : vector<2x16x2xf32>
    %cst_25 = arith.constant dense<0.000000e+00> : vector<2x2xf32>
    %79 = vector.multi_reduction <add>, %78, %cst_25 [1] : vector<2x16x2xf32> to vector<2x2xf32>
    %80 = arith.addf %48, %79 : vector<2x2xf32>
    %c0_26 = arith.constant 0 : index
    %c0_27 = arith.constant 0 : index
    %c0_28 = arith.constant 0 : index
    %81 = vector.load %arg6[%c0_26, %c0_27, %c0_28] : memref<2x1x2xf32, #tpu.memory_space<vmem>>, vector<2x1x2xf32>
    %82 = vector.shape_cast %81 : vector<2x1x2xf32> to vector<2x2xf32>
    %83 = vector.shape_cast %80 : vector<2x2xf32> to vector<2x1x2xf32>
    tpu.vector_store %arg6[%c0_26, %c0_27, %c0_28], %83 {strides = array<i32>} : memref<2x1x2xf32, #tpu.memory_space<vmem>>, vector<2x1x2xf32>,
    return
  }
  func.func @transform_0(%arg0: i32) -> (i32, i32, i32) {
    %c0_i32 = arith.constant 0 : i32
    %c0_i32_0 = arith.constant 0 : i32
    %c0_i32_1 = arith.constant 0 : i32
    return %arg0, %c0_i32, %c0_i32_0 : i32, i32, i32
  }
  func.func @transform_1(%arg0: i32) -> (i32, i32, i32) {
    %c0_i32 = arith.constant 0 : i32
    %c0_i32_0 = arith.constant 0 : i32
    %c0_i32_1 = arith.constant 0 : i32
    return %arg0, %c0_i32, %c0_i32_0 : i32, i32, i32
  }
  func.func @transform_2(%arg0: i32) -> (i32, i32) {
    %c0_i32 = arith.constant 0 : i32
    %c0_i32_0 = arith.constant 0 : i32
    %c0_i32_1 = arith.constant 0 : i32
    return %c0_i32, %c0_i32_0 : i32, i32
  }
  func.func @transform_3(%arg0: i32) -> (i32, i32) {
    %c0_i32 = arith.constant 0 : i32
    %c0_i32_0 = arith.constant 0 : i32
    %c0_i32_1 = arith.constant 0 : i32
    return %c0_i32, %c0_i32_0 : i32, i32
  }
  func.func @transform_4(%arg0: i32) -> (i32, i32) {
    %c0_i32 = arith.constant 0 : i32
    %c0_i32_0 = arith.constant 0 : i32
    %c0_i32_1 = arith.constant 0 : i32
    return %c0_i32, %c0_i32_0 : i32, i32
  }
  func.func @transform_5(%arg0: i32) -> (i32, i32, i32) {
    %c0_i32 = arith.constant 0 : i32
    %c0_i32_0 = arith.constant 0 : i32
    %c0_i32_1 = arith.constant 0 : i32
    return %arg0, %c0_i32, %c0_i32_0 : i32, i32, i32
  }
}

</mosaic_0001>

<bundles_post_ra>
// kernel: tpu_custom_call.1
= control target key start
LH: loop header
LB: loop body
LE: loop exit
PB: predicated region body
PF: predicated region fallthrough
CT: control target
= control target key end

     0   :  { %s1213_s0 = inlined_call_operand.hbm [shape: f32[4,16,32], index: 0, kind: input, shape index: {}]   ;;  %s1214_s1 = inlined_call_operand.vmem [shape: s32[4,1,4], index: 1, kind: input, shape index: {}]   ;;  %s1215_s2 = inlined_call_operand.vmem [shape: f32[32,5], index: 2, kind: input, shape index: {}]   ;;  %s1216_s3 = inlined_call_operand.<no memory space> [shape: f32[1,1], index: 3, kind: input, shape index: {}]   ;;  %s1217_s4 = inlined_call_operand.vmem [shape: f32[1,2], index: 4, kind: input, shape index: {}]   ;;  %s1218_s5 = inlined_call_operand.vmem [shape: f32[4,1,2], index: 5, kind: output, shape index: {}]  }
   0x1   :  { %10 = sst [smem:[#allocation2]] %s1216_s3 }
   0x2   :  { %11 = vsyncpa [#allocation4], 0 }
   0x3   :  { %13 = vsyncpa [#allocation4 + $0x1], 0  ;;  %s1011_s20 = smov 0   ;;  %s1013_s21 = smov 0  }
   0x4   :  { %s1015_s22 = smov 0   ;;  %s1017_s23 = smov 0  }
   0x5 LB: > { %s782_s3 = sadd.s32 4294967295, %s966_s23   ;;  %s1031_s24 = sadd.s32 1, %s966_s23   ;;  %s966_s23 = sphi %s1017_s23, %s1225_s23   ;;  %s962_s22 = sphi %s1015_s22, %s1224_s22   ;;  %s958_s21 = sphi %s1013_s21, %s1223_s21   ;;  %s954_s20 = sphi %s1011_s20, %s1222_s20  }
   0x6   : > { %s23_s25 = ssub.s32 %s966_s23, %s1031_s24  ;;  %s26_s26 = sadd.s32 1, %s962_s22 }
   0x7   : > { %p24_p0 = scmp.eq.s32.totalorder %s23_s25, 0  ;;  %p33_p1 = scmp.ne.s32.totalorder %s962_s22, %s958_s21 }
   0x8   : > { %p34_p2 = scmp.eq.s32.totalorder %s966_s23, 0  ;;  %p39_p3 = scmp.ne.s32.totalorder %s958_s21, %s954_s20 }
   0x9   : > { %s1041_s27 = scalar_select %p24_p0, %s962_s22, %s26_s26  }
   0xa   : > { %p35_p4 = por %p34_p2, %p33_p1  ;;  %p40_p5 = scmp.eq.s32.totalorder %s782_s3, 0 }
   0xb   : > { %p843_p6 = scmp.lt.s32.totalorder %s966_s23, 2  ;;  %s187_s29 = sand.u32 1, %s962_s22  }
   0xc   : > { %p1046_p7 = por %p40_p5, %p39_p3  ;;  %s786_s30 = sshll.u32 %s187_s29, 5 }
   0xd   : > { %s802_s6 = sshll.u32 %s966_s23, 9  ;;  %s191_s10 = scalar_lea.vmem [#allocation3], %s786_s30 }
   0xe   : > { %s1055_s9 = scalar_lea.hbm %s1213_s0, %s802_s6  ;;  %s199_s11 = sshll.u32 %s191_s10, 4  ;;  %s1057_s11 = int_to_ptr.vmem [resolvable:$true] %s199_s11 }
   0xf   : > { %p1059_p8 = pnand %p843_p6, %p35_p4  ;;  %s1064_s13 = scalar_lea.sflag [#allocation4], %s187_s29 }
  0x10   : > { %s902_s14 = scalar_lea.hbm %s1055_s9, 512  ;;  %s907_s17 = scalar_lea.hbm %s1213_s0, 1024 }
  0x11   : > { %p903_p10 = scmp.ne.s32.totalorder %s1055_s9, %s902_s14  ;;  %p904_p11 = pneg %p1059_p8 }
  0x12   : > { %p908_p0 = scmp.lt.u32.totalorder %s1055_s9, %s1213_s0  ;;  %p909_p1 = scmp.lt.u32.totalorder %s907_s17, %s902_s14 }
  0x13   : > { %p905_p12 = pnand %p904_p11, %p903_p10  ;;  %p911_p3 = scmp.lt.u32.totalorder %s902_s14, %s1055_s9 }
  0x14   : > { %p910_p2 = por %p909_p1, %p908_p0 }
  0x15   : > { %p906_p13 = pneg %p905_p12 }
  0x16   : > { %p912_p4 = por %p911_p3, %p910_p2 }
  0x18   : > { %p913_p5 = pnand %p912_p4, %p906_p13 }
  0x1a   : > { %916 = shalt.err (!%p913_p5)
}
  0x1b   : > { %s917_s20 = scalar_lea.vmem %s1057_s11, 512  ;;  %s968_s25 = smov [#allocation3]  }
  0x1c   : > { %p918_p6 = scmp.ne.s32.totalorder %s1057_s11, %s917_s20  ;;  %s922_s26 = sshll.u32 %s968_s25, 4  ;;  %s923_s26 = int_to_ptr.vmem [resolvable:$false] %s922_s26 }
  0x1d   : > { %s924_s29 = scalar_lea.vmem %s923_s26, 1024  ;;  %p925_p9 = scmp.lt.s32.totalorder %s1057_s11, %s923_s26 }
  0x1e   : > { %p920_p10 = pnand %p918_p6, %p904_p11  ;;  %p926_p0 = scmp.lt.s32.totalorder %s924_s29, %s917_s20 }
  0x20   : > { %p921_p12 = pneg %p920_p10  ;;  %p927_p1 = por %p926_p0, %p925_p9 }
  0x22   : > { %p928_p2 = pnand %p927_p1, %p921_p12 }
  0x24   : > { %931 = shalt.err (!%p928_p2)
}
  0x25   : > { %s969_s30 = smov 128   ;;  %s970_s6 = smov 8  }
  0x26   : > { %842 = dma.hbm_to_vmem [thread:$0]  (!%p1059_p8), %s1055_s9, 512, %s1057_s11, %s1064_s13, %s969_s30, %s969_s30, %s970_s6  }
  0x27   : > { %p215_p11 = scmp.lt.s32.totalorder %s966_s23, 3  ;;  %p1221_p13 = scmp.ge.s32.totalorder %s966_s23, 1 }
  0x29   : > { %p216_p3 = pnand %p1221_p13, %p215_p11 }
  0x2a   : > { %s221_s7 = sand.u32 (!%p216_p3), 1, %s958_s21  }
  0x2b   : > { %219 = sbr.rel (%p216_p3) target bundleno = 1005 (0x3ed), region = 40  ;;  %s791_s8 = sshll.u32 (!%p216_p3), %s221_s7, 5 }
  0x2c   : > { %s222_s10 = scalar_lea.sflag (!%p216_p3), [#allocation4], %s221_s7  ;;  %s1096_s14 = scalar_lea.vmem (!%p216_p3), [#allocation3], %s791_s8 }
  0x32   : > { %949 = dma.done.wait (%p1046_p7), %s222_s10, 512  }
  0x33   : > { %951 = vsyncadd (%p1046_p7), %s222_s10, 4294966784  ;;  %s792_s9 = sshll.u32 %s782_s3, 1  ;;  %v971_v0 = vmov 1   ;;  %v972_v1 = vmov 0   ;;  %vm274_vm0 = vcmask 261120   ;;  %v270_v2 = vld [vmem:[%s1215_s2] sm:$0xff]  ;;  %v378_v29 = vlaneseq }
  0x34   : > { %886 = vset.pattern.permute.xlu1 %v971_v0  ;;  %885 = vset.pattern.permute.xlu0 %v972_v1  ;;  %p257_p8 = scmp.lt.s32.totalorder %s792_s9, 3  ;;  %v271_v3 = vld [vmem:[%s1215_s2 + $0x8] sm:$0xff]  ;;  %v272_v4 = vld [vmem:[%s1215_s2 + $0x10] sm:$0xff]  ;;  %v273_v6 = vld [vmem:[%s1215_s2 + $0x18] sm:$0xff]  ;;  %v973_v14 = vmov 2   ;;  %v974_v15 = vmov 3  }
  0x35   : > { %v825_v5 = vpack.c.bf16 %v271_v3, %v270_v2  ;;  %v266_v7 = vld [vmem:[%s1096_s14] sm:$0xff]  ;;  %v829_v8 = vpack.c.bf16 %v273_v6, %v272_v4  ;;  %v268_v9 = vld [vmem:[%s1096_s14 + $0x10] sm:$0xff]  ;;  %v267_v12 = vld [vmem:[%s1096_s14 + $0x8] sm:$0xff]  ;;  %s372_s20 = sld [smem:[#allocation2]]  ;;  %v1142_v30 = vshrl.u32 %v378_v29, 7  ;;  %v379_v52 = vand.u32 127, %v378_v29 }
  0x36   : > { %s1227_s9 = smov (!%p257_p8, %s792_s9), 3  ;;  %819 = vmatprep.mubr.msk.f32.mxu0 %vm274_vm0, %v266_v7  ;;  %822 = vmatprep.mubr.msk.f32.mxu1 %vm274_vm0, %v268_v9  ;;  %v269_v13 = vld [vmem:[%s1096_s14 + $0x18] sm:$0xff]  ;;  %v975_v34 = vmov 1966171168   ;;  %vm476_vm1 = vcmask 130112   ;;  %vm487_vm5 = vcmask 1041409  }
  0x37   : > { %s259_s17 = scalar_lea.vmem %s1214_s1, %s1227_s9  ;;  %826 = vmatprep.subr.bf16.mxu0 %v825_v5  ;;  %833 = vmatprep.subr.bf16.mxu1 %v825_v5  ;;  %v1145_v33 = vsub.s32 0, %v1142_v30  ;;  %v406_v35 = vunpack.c.l.s4 %v975_v34  ;;  %v471_v58 = vadd.s32 4294967288, %v379_v52  ;;  %v469_v59 = vsub.s32 %v379_v52, %v1142_v30  ;;  %s976_s25 = smov 127  }
  0x38   : > { %v380_v10 = vld [vmem:[%s259_s17] sm:$0x1]  ;;  %828 = vmatpush3.bf16.msra.mxu0 %v825_v5  ;;  %835 = vmatpush3.bf16.msra.mxu1 %v825_v5  ;;  %v381_v11 = vld [vmem:[%s259_s17 + $0x1] sm:$0x1]  ;;  %vm491_vm7 = vcmask 123904   ;;  %vm531_vm12 = vcmask 23560   ;;  %s264_s8 = scalar_lea.vmem %s1218_s5, %s1227_s9 }
  0x39   : > { %830 = vmatprep.subr.bf16.mxu0 %v829_v8  ;;  %834 = vmatprep.subr.bf16.mxu1 %v829_v8  ;;  %v407_v40 = vunpack.c.0.s8 %v406_v35  ;;  %vm658_vm13 = vcmask 39960   ;;  %s977_s26 = smov 125   ;;  %vm709_vm14 = vcmask 8192  }
  0x3a   : > { %421 = vperm.xlu1 %886, %v380_v10   ;;  %391 = vperm.xlu0 %885, %v380_v10  }
  0x3b   : > { %v373_v16 = vstv %s372_s20  ;;  %v1156_v47 = vsub.s32 %v407_v40, %v1142_v30 }
  0x3c   : > { %832 = vmatpush3.bf16.msra.mxu0 %v829_v8  ;;  %836 = vmatpush3.bf16.msra.mxu1 %v829_v8 }
  0x3e   : > { %428 = vperm.xlu1 %886, %v381_v11   ;;  %398 = vperm.xlu0 %885, %v381_v11  }
  0x3f   : > { %820 = vmatmul.mubr.msk.f32.vlgmr.msra.gmra.mrb[0].mxu0 %vm274_vm0, %v267_v12  ;;  %823 = vmatmul.mubr.msk.f32.vlgmr.msra.gmra.mrb[0].mxu1 %vm274_vm0, %v269_v13 }
  0x42   : > { %888 = vset.pattern.permute.xlu1 %v973_v14  ;;  %887 = vset.pattern.permute.xlu0 %v973_v14 }
  0x43   : > { %565 = vperm.xlu1 %888, %v381_v11   ;;  %558 = vperm.xlu0 %887, %v380_v10  }
  0x47   : > { %889 = vset.pattern.permute.xlu1 %v974_v15  ;;  %890 = vset.pattern.permute.xlu0 %v974_v15 }
  0x48   : > { %588 = vperm.xlu1 %889, %v380_v10   ;;  %595 = vperm.xlu0 %890, %v381_v11  }
  0x4c   : > { %891 = vset.pattern.permute.xlu1 %v972_v1  ;;  %892 = vset.pattern.permute.xlu0 %v972_v1  ;;  %v474_v1 = vsub.s32 %v471_v58, %v1142_v30 }
  0xb9   : > { %v422_v25 = vpop.permute.xlu1 %421  ;;  %v392_v26 = vpop.permute.xlu0 %391 }
  0xba   : > { %v426_v38 = vrot.slane %v422_v25, %v1145_v33  ;;  %v396_v39 = vrot.slane %v392_v26, %v1145_v33 }
  0xbd   : > { %v429_v27 = vpop.permute.xlu1 %428  ;;  %v399_v28 = vpop.permute.xlu0 %398 }
  0xbe   : > { %v433_v41 = vrot.slane %v429_v27, %v1145_v33  ;;  %v403_v42 = vrot.slane %v399_v28, %v1145_v33 }
  0xc0   : > { %v434_v48 = vcombine.low %v426_v38, %v433_v41  ;;  %v404_v49 = vcombine.low %v396_v39, %v403_v42  ;;  %v518_v38 = vsub.s32 1, %v1142_v30 }
  0xc2   : > { %v566_v31 = vpop.permute.xlu1 %565  ;;  %v559_v32 = vpop.permute.xlu0 %558  ;;  %v441_v53 = vrot.slane %v434_v48, %v1156_v47  ;;  %v411_v54 = vrot.slane %v404_v49, %v1156_v47 }
  0xc3   : > { %v570_v43 = vrot.slane %v566_v31, %v1145_v33  ;;  %v563_v44 = vrot.slane %v559_v32, %v1145_v33 }
  0xc4   : > { %v418_v63 = vrot.slane %v411_v54, %v1156_v47  ;;  %v448_v0 = vrot.slane %v441_v53, %v1156_v47 }
  0xc5   : > { %v571_v50 = vcombine.low %v563_v44, %v570_v43 }
  0xc6   : > { %vm419_vm3 = vcmp.ge.s32.totalorder %v379_v52, %v418_v63  ;;  %vm449_vm4 = vcmp.le.s32.totalorder %v379_v52, %v448_v0 }
  0xc7   : > { %v589_v36 = vpop.permute.xlu1 %588  ;;  %v596_v37 = vpop.permute.xlu0 %595  ;;  %v578_v55 = vrot.slane %v571_v50, %v1156_v47  ;;  %vm450_vm8 = vmand %vm419_vm3, %vm449_vm4 }
  0xc8   : > { %v593_v45 = vrot.slane %v589_v36, %v1145_v33  ;;  %v600_v46 = vrot.slane %v596_v37, %v1145_v33 }
  0xc9   : > { %v585_v62 = vrot.slane %v578_v55, %v1156_v47 }
  0xca   : > { %v601_v51 = vcombine.low %v593_v45, %v600_v46 }
  0xcb   : > { %vm586_vm2 = vcmp.ge.s32.totalorder %v379_v52, %v585_v62 }
  0xcc   : > { %v608_v57 = vrot.slane %v601_v51, %v1156_v47 }
  0xce   : > { %v615_v2 = vrot.slane %v608_v57, %v1156_v47 }
  0xd0   : > { %vm616_vm6 = vcmp.le.s32.totalorder %v379_v52, %v615_v2 }
  0xd1   : > { %vm617_vm9 = vmand %vm586_vm2, %vm616_vm6 }
 0x112   : > { %v1130_v17 = vpop.f32.mrb[0].mxu0  ;;  %v1132_v18 = vpop.f32.mrb[0].mxu1 }
 0x113   : > { %v375_v19 = vadd.f32 %v1130_v17, %v373_v16  ;;  %v1135_v20 = vpop.f32.mrb[1].mxu0  ;;  %v1137_v21 = vpop.f32.mrb[1].mxu1  ;;  %v377_v24 = vadd.f32 %v1132_v18, %v373_v16 }
 0x114   : > { %v376_v22 = vadd.f32 %v373_v16, %v1137_v21  ;;  %v374_v23 = vadd.f32 %v373_v16, %v1135_v20 }
 0x115   : > { %459 = vperm.xlu1 %891, %v375_v19  }
 0x116   : > { %462 = vperm.xlu0 %892, %v376_v22  }
 0x119   : > { %456 = vperm.xlu1 %891, %v374_v23  }
 0x11a   : > { %893 = vset.pattern.permute.xlu0 %v974_v15 }
 0x11d   : > { %465 = vperm.xlu1 %891, %v377_v24  }
 0x194   : > { %v460_v56 = vpop.permute.xlu1 %459 }
 0x195   : > { %v463_v61 = vpop.permute.xlu0 %462  ;;  %v475_v6 = vrot.slane %v460_v56, %v474_v1 }
 0x196   : > { %v481_v4 = vrot.slane %v463_v61, %v469_v59 }
 0x198   : > { %v457_v60 = vpop.permute.xlu1 %456 }
 0x199   : > { %v470_v3 = vrot.slane %v457_v60, %v469_v59 }
 0x19b   : > { %v477_v8 = vsel %vm476_vm1, %v475_v6, %v470_v3 }
 0x19c   : > { %v466_v5 = vpop.permute.xlu1 %465 }
 0x19d   : > { %v485_v7 = vrot.slane %v466_v5, %v474_v1 }
 0x19f   : > { %v486_v9 = vsel %vm476_vm1, %v485_v7, %v481_v4 }
 0x1a0   : > { %v488_v10 = vsel %vm487_vm5, %v486_v9, %v477_v8 }
 0x1a1   : > { %v618_v11 = vsel %vm617_vm9, %v488_v10, -1e+30  ;;  %v490_v12 = vsel %vm450_vm8, %v488_v10, -1e+30 }
 0x1a2   : > { %v619_v13 = vsel %vm491_vm7, %v618_v11, -inf  ;;  %v492_v14 = vsel %vm491_vm7, %v490_v12, -inf }
 0x1a3   : > { %620 = vmax.xlane.f32.xlu0 %v619_v13  ;;  %493 = vmax.xlane.f32.xlu1 %v492_v14 }
 0x230   : > { %v621_v15 = vpop.xlane.xlu0 %620  ;;  %v494_v16 = vpop.xlane.xlu1 %493 }
 0x231   : > { %v622_v19 = vsub.f32 %v618_v11, %v621_v15  ;;  %v495_v22 = vsub.f32 %v490_v12, %v494_v16  ;;  %vm501_vm10 = vcmp.gt.f32.partialorder %v494_v16, -5e+29  ;;  %vm628_vm11 = vcmp.gt.f32.partialorder %v621_v15, -5e+29 }
 0x233   : > { %v623_v23 = vmul.f32 1.442695, %v622_v19  ;;  %v496_v24 = vmul.f32 1.442695, %v495_v22 }
 0x235   : > { %894 = vpow2.f32 %v623_v23 }
 0x236   : > { %896 = vpow2.f32 %v496_v24 }
 0x23f   : > { %v895_v25 = vpop.eup %894 }
 0x240   : > { %v897_v26 = vpop.eup %896  ;;  %v625_v27 = vsel %vm491_vm7, %v895_v25, 0.0 }
 0x241   : > { %626 = vadd.xlane.f32.xlu1 %v625_v27  ;;  %v498_v28 = vsel %vm491_vm7, %v897_v26, 0.0 }
 0x242   : > { %499 = vadd.xlane.f32.xlu0 %v498_v28 }
 0x2ce   : > { %v627_v31 = vpop.xlane.xlu1 %626 }
 0x2cf   : > { %v500_v29 = vpop.xlane.xlu0 %499 }
 0x2d0   : > { %898 = vrcp.f32 %v500_v29 }
 0x2d1   : > { %900 = vrcp.f32 %v627_v31 }
 0x2da   : > { %v899_v32 = vpop.eup %898 }
 0x2db   : > { %v503_v34 = vsel %vm501_vm10, %v899_v32, 0.0  ;;  %v901_v35 = vpop.eup %900 }
 0x2dc   : > { %v504_v36 = vmul.f32 %v897_v26, %v503_v34  ;;  %v630_v39 = vsel %vm628_vm11, %v901_v35, 0.0  ;;  %v798_v35 = vld [vmem:[%s1217_s4] ss:$0 sm:$0xff] }
 0x2dd   : > { %v631_v41 = vmul.f32 %v895_v25, %v630_v39 }
 0x2de   : > { %v508_v37 = vrot.slane %v504_v36, %v1145_v33  ;;  %v519_v40 = vrot.slane %v504_v36, %v518_v38 }
 0x2df   : > { %v635_v42 = vrot.slane %v631_v41, %v1145_v33  ;;  %v646_v43 = vrot.slane %v631_v41, %v518_v38 }
 0x2e0   : > { %514 = vbcast.lane.b32.xlu1 %v508_v37, 264  ;;  %510 = vbcast.lane.b32.xlu0 %v508_v37, 256 }
 0x2e4   : > { %521 = vbcast.lane.b32.xlu1 %v519_v40, 256  ;;  %525 = vbcast.lane.b32.xlu0 %v519_v40, 264 }
 0x2e8   : > { %641 = vbcast.lane.b32.xlu0 %v635_v42, 264  ;;  %637 = vbcast.lane.b32.xlu1 %v635_v42, 256 }
 0x2ec   : > { %652 = vbcast.lane.b32.xlu0 %v646_v43, 264  ;;  %648 = vbcast.lane.b32.xlu1 %v646_v43, 256 }
 0x352   : > { %v511_v44 = vpop.permute.xlu0 %510  ;;  %v515_v45 = vpop.permute.xlu1 %514 }
 0x353   : > { %v527_v46 = vmul.f32 %v511_v44, %v1135_v20  ;;  %v528_v30 = vmul.f32 %v1130_v17, %v515_v45 }
 0x355   : > { %v532_v48 = vsel %vm531_vm12, %v527_v46, 0.0  ;;  %v533_v49 = vsel %vm531_vm12, %v528_v30, 0.0 }
 0x356   : > { %v534_v50 = vadd.f32 %v533_v49, %v532_v48  ;;  %v526_v51 = vpop.permute.xlu0 %525  ;;  %v522_v52 = vpop.permute.xlu1 %521 }
 0x357   : > { %v530_v53 = vmul.f32 %v1132_v18, %v526_v51  ;;  %v529_v33 = vmul.f32 %v522_v52, %v1137_v21 }
 0x358   : > { %v535_v54 = vrot.slane %v534_v50, 4 }
 0x359   : > { %v542_v55 = vsel %vm531_vm12, %v530_v53, 0.0  ;;  %v541_v56 = vsel %vm531_vm12, %v529_v33, 0.0 }
 0x35a   : > { %v536_v57 = vadd.f32 %v535_v54, %v534_v50  ;;  %v543_v58 = vadd.f32 %v542_v55, %v541_v56  ;;  %v642_v59 = vpop.permute.xlu0 %641  ;;  %v638_v60 = vpop.permute.xlu1 %637 }
 0x35b   : > { %v655_v61 = vmul.f32 %v1130_v17, %v642_v59  ;;  %v654_v62 = vmul.f32 %v638_v60, %v1135_v20 }
 0x35c   : > { %v537_v63 = vrot.slane %v536_v57, 2  ;;  %v544_v0 = vrot.slane %v543_v58, 4 }
 0x35d   : > { %v660_v1 = vsel %vm658_vm13, %v655_v61, 0.0  ;;  %v659_v2 = vsel %vm658_vm13, %v654_v62, 0.0 }
 0x35e   : > { %v538_v3 = vadd.f32 %v537_v63, %v536_v57  ;;  %v545_v4 = vadd.f32 %v544_v0, %v543_v58  ;;  %v661_v5 = vadd.f32 %v660_v1, %v659_v2  ;;  %v653_v6 = vpop.permute.xlu0 %652  ;;  %v649_v7 = vpop.permute.xlu1 %648 }
 0x35f   : > { %v657_v8 = vmul.f32 %v1132_v18, %v653_v6  ;;  %v656_v9 = vmul.f32 %v649_v7, %v1137_v21 }
 0x360   : > { %v546_v10 = vrot.slane %v545_v4, 2  ;;  %v662_v11 = vrot.slane %v661_v5, 4  ;;  %v539_v15 = vrot.slane %v538_v3, 1 }
 0x361   : > { %v669_v17 = vsel %vm658_vm13, %v657_v8, 0.0  ;;  %v668_v20 = vsel %vm658_vm13, %v656_v9, 0.0 }
 0x362   : > { %v547_v12 = vadd.f32 %v546_v10, %v545_v4  ;;  %v663_v13 = vadd.f32 %v662_v11, %v661_v5  ;;  %v670_v14 = vadd.f32 %v669_v17, %v668_v20  ;;  %v540_v25 = vadd.f32 %v539_v15, %v538_v3 }
 0x364   : > { %v664_v16 = vrot.slane %v663_v13, 2  ;;  %v671_v19 = vrot.slane %v670_v14, 4  ;;  %v548_v22 = vrot.slane %v547_v12, 1 }
 0x366   : > { %v665_v23 = vadd.f32 %v664_v16, %v663_v13  ;;  %v672_v24 = vadd.f32 %v671_v19, %v670_v14  ;;  %v549_v26 = vadd.f32 %v548_v22, %v547_v12 }
 0x368   : > { %v673_v18 = vrot.slane %v672_v24, 2  ;;  %v552_v21 = vsel %vm487_vm5, %v549_v26, %v540_v25  ;;  %v666_v28 = vrot.slane %v665_v23, 1 }
 0x369   : > { %553 = vrot.lane.b32.xlu1 %v552_v21, %s976_s25 }
 0x36a   : > { %v674_v27 = vadd.f32 %v673_v18, %v672_v24  ;;  %v667_v31 = vadd.f32 %v666_v28, %v665_v23 }
 0x36c   : > { %v675_v29 = vrot.slane %v674_v27, 1 }
 0x36e   : > { %v676_v32 = vadd.f32 %v675_v29, %v674_v27 }
 0x370   : > { %v679_v34 = vsel %vm487_vm5, %v676_v32, %v667_v31 }
 0x371   : > { %680 = vrot.lane.b32.xlu0 %v679_v34, %s977_s26 }
 0x3db   : > { %v554_v36 = vpop.permute.xlu1 %553 }
 0x3dc   : > { %v556_v37 = vadd.f32 %v798_v35, %v554_v36 }
 0x3e3   : > { %v681_v38 = vpop.permute.xlu0 %680 }
 0x3e4   : > { %v683_v39 = vadd.f32 %v681_v38, %v556_v37 }
 0x3e6   : > { %v691_v40 = vrot.slane %v683_v39, %v1156_v47 }
 0x3e8   : > { %v692_v41 = vcombine.high %v691_v40, %v691_v40  ;;  %v699_v42 = vrot.slane %v691_v40, %v1156_v47 }
 0x3ea   : > { %v706_v43 = vrot.slane %v692_v41, %v1156_v47  ;;  %710 = vst.msk [vmem:[%s264_s8] sm:$0x1] %vm709_vm14, %v699_v42 }
 0x3ec   : > { %711 = vst.msk [vmem:[%s264_s8 + $0x1] sm:$0x1] %vm709_vm14, %v706_v43 }
 0x3ed PF: > { %p16_p7 = scmp.ge.s32.totalorder %s1031_s24, 4   ;;  %s1222_s20 = smov %s958_s21 }
 0x3ee   : > { %s1223_s21 = smov %s962_s22  ;;  %s1224_s22 = smov %s1041_s27 }
 0x3ef   : > { %s1225_s23 = smov %s1031_s24  ;;  %18 = sbr.rel (!%p16_p7) target bundleno = 5 (0x5), region = 83 }
 0x3f6   :  { %732 = vsyncpa [#allocation4], 1 }
 0x3f7   :  { %734 = vsyncpa [#allocation4 + $0x1], 1 }

</bundles_post_ra>
